<compile_context>
chip_gen: v7x
topology: tpu7x:2x2x1
jax: 0.10.0
libtpu: 0.0.40
codegen_flags: <defaults>
</compile_context>

<pallas_src>
import functools

import jax
import jax.numpy as jnp
from jax.experimental import pallas as pl
from jax.experimental.pallas import tpu as pltpu

_MXU_TILE = 256  # native MXU tile on v6e/v7x (v5e is 128; 256/512 are multiples)


# --------------------------------------------------------------------------
# Kernel
# --------------------------------------------------------------------------
def _moe_expert_kernel(alias_ref, x_ref, cw_ref, w13_ref, w2_ref, o_ref,
                       acc_ref, *, th):
    # alias_ref: (row_tiles, E) int32 SMEM  -- alias[i, e] == e iff expert e is
    #            routed to some token of row tile i
    # x_ref    : (tm, D)        token tile (resident across e, h)
    # cw_ref   : (1, tm, 1) f32 combine weight of expert e for this tile
    # w13_ref  : (1, D, 2*th)   [w1_chunk | w3_chunk] of expert e, H-chunk h
    # w2_ref   : (1, th, D)     w2 H-chunk of expert e
    # o_ref    : (tm, D)        output tile (resident across e, h)
    # acc_ref  : (tm, D) f32    accumulator scratch
    i = pl.program_id(0)
    e = pl.program_id(1)
    h = pl.program_id(2)

    @pl.when((e == 0) & (h == 0))
    def _init():
        acc_ref[...] = jnp.zeros_like(acc_ref)

    @pl.when(alias_ref[i, e] == e)          # skip experts with no routed tokens
    def _compute():
        x = x_ref[...]
        h13 = jnp.dot(x, w13_ref[0], preferred_element_type=jnp.float32)
        h1 = h13[:, :th]                    # silu branch
        h3 = h13[:, th:]                    # linear branch
        hid = (jax.nn.silu(h1) * h3).astype(x.dtype)
        y = jnp.dot(hid, w2_ref[0], preferred_element_type=jnp.float32)
        acc_ref[...] += cw_ref[0].astype(jnp.float32) * y

    @pl.when((e == pl.num_programs(1) - 1) & (h == pl.num_programs(2) - 1))
    def _finalize():
        o_ref[...] = acc_ref[...].astype(o_ref.dtype)


# --------------------------------------------------------------------------
# Tiling / routing helpers
# --------------------------------------------------------------------------
def _round_up(x, m):
    return (x + m - 1) // m * m


def _vmem_budget():
    """Generation-aware (tile budget, vmem_limit_bytes)."""
    try:
        cap = int(pltpu.get_tpu_info().vmem_capacity_bytes)
    except Exception:
        cap = 64 * 1024 * 1024          # conservative (v7x per-TC VMEM)
    budget = int(0.70 * cap)
    limit = max(48 * 1024 * 1024, min(int(0.85 * cap), 112 * 1024 * 1024))
    return budget, limit


def _tilings(rows, d, h, itemsize, budget):
    """Pick (row tile, padded rows, H chunk, padded H) under a VMEM budget."""
    sublane = {4: 8, 2: 16, 1: 32}.get(itemsize, 8)
    rows_sub = _round_up(rows, sublane)

    if rows_sub <= 2 * _MXU_TILE:
        tm_cands = [rows_sub]                                   # one tile
    elif rows_sub <= 4 * _MXU_TILE:
        # two tiles so both v7x TensorCores get work
        tm_cands = [_round_up(pl.cdiv(rows_sub, 2), sublane), _MXU_TILE, 128]
    else:
        tm_cands = [512, _MXU_TILE, 128]                        # MXU-aligned

    tm = tm_cands[-1]
    th = 128
    for cand in tm_cands:
        act_bytes = cand * d * (3 * itemsize + 4)   # x + out (dbl-buf) + f32 acc
        per_th = 6 * d * itemsize + 12 * cand       # dbl-buf w13/w2 + f32 temps
        avail = budget - act_bytes
        if avail < per_th * min(h, 128) and cand != tm_cands[-1]:
            continue                                # too big: shrink row tile
        tm = cand
        th = int(max(avail, per_th * 128) // per_th)
        break

    if th >= h:
        th = h                                      # single H chunk, no padding
    else:
        th = max(128, th // 128 * 128)              # lane-aligned H chunk
    rows_padded = _round_up(rows, tm)
    h_padded = _round_up(h, th)
    return tm, rows_padded, th, h_padded


def _route(x2d, gate_w, topk):
    """Gate + top-k + softmax -> dense f32 combine weights (0 if unselected)."""
    logits = jnp.dot(x2d, gate_w, preferred_element_type=jnp.float32)
    top_vals, top_idx = jax.lax.top_k(logits, topk)          # f32 through top_k
    sw = jax.nn.softmax(top_vals, axis=-1)                   # f32
    num_experts = gate_w.shape[1]
    onehot = top_idx[..., None] == jnp.arange(num_experts, dtype=top_idx.dtype)
    return jnp.sum(jnp.where(onehot, sw[..., None], 0.0), axis=-2)   # (rows, E)


def _expert_alias(cw_tiles):
    """(row_tiles, tm, E) weights -> (row_tiles, E) int32 alias table.

    alias[i, e] == e iff expert e has a routed token in tile i; otherwise it
    points at the most recently active expert so the skipped expert's weight
    DMA resolves to an already-resident block (elided by the pipeliner).
    """
    active = jnp.any(cw_tiles != 0, axis=1)                       # (tiles, E)
    num_experts = active.shape[-1]
    eidx = jnp.arange(num_experts, dtype=jnp.int32)
    last = jax.lax.cummax(jnp.where(active, eidx, -1), axis=1)
    first = jnp.argmax(active, axis=1).astype(jnp.int32)
    return jnp.where(last >= 0, last, first[:, None]).astype(jnp.int32)


def _pack_w13(w1, w3, th, h_padded):
    """Pack w1/w3 into (E, D, 2*h_padded); chunk j columns = [w1_j | w3_j]."""
    num_e, d, h = w1.shape
    if h_padded != h:
        w1 = jnp.pad(w1, ((0, 0), (0, 0), (0, h_padded - h)))
        w3 = jnp.pad(w3, ((0, 0), (0, 0), (0, h_padded - h)))
    nc = h_padded // th
    w13 = jnp.stack(
        [w1.reshape(num_e, d, nc, th), w3.reshape(num_e, d, nc, th)], axis=3)
    return w13.reshape(num_e, d, 2 * h_padded)


# --------------------------------------------------------------------------
# Wrapper
# --------------------------------------------------------------------------
def moe_forward(x, gate_w, w1, w3, w2, topk):
    """MoE forward matching the PyTorch MoeLayer (SwiGLU experts)."""
    B, S, D = x.shape
    E, D2, H = w1.shape
    assert D2 == D and gate_w.shape == (D, E)
    assert w3.shape == (E, D, H) and w2.shape == (E, H, D)

    rows = B * S
    x2d = x.reshape(rows, D)

    # 1) Routing in the wrapper (tiny O(rows*E) work; f32 through top_k).
    cw = _route(x2d, gate_w, topk)                    # (rows, E) f32

    # 2) Tiling: generation-aware VMEM budget, big row tiles, H-chunked weights.
    itemsize = jnp.dtype(x.dtype).itemsize
    budget, vmem_limit = _vmem_budget()
    tm, rows_padded, th, h_padded = _tilings(rows, D, H, itemsize, budget)

    pad = rows_padded - rows
    if pad:
        x2d = jnp.pad(x2d, ((0, pad), (0, 0)))
        cw = jnp.pad(cw, ((0, pad), (0, 0)))          # padded tokens: weight 0

    ntiles = rows_padded // tm
    n_h = h_padded // th

    # Per-(row tile, expert) skip/alias table, scalar-prefetched into SMEM.
    alias = _expert_alias(cw.reshape(ntiles, tm, E))

    # Combine weights as (E, rows_padded, 1): each step loads a (tm, 1) column.
    cw_e = jnp.transpose(cw, (1, 0))[:, :, None]

    # Fused gate/up weights (single x @ w13 matmul per H chunk) and padded w2.
    w13 = _pack_w13(w1, w3, th, h_padded)             # (E, D, 2*h_padded)
    w2p = jnp.pad(w2, ((0, 0), (0, h_padded - H), (0, 0))) if h_padded != H else w2

    kernel = functools.partial(_moe_expert_kernel, th=th)
    out2d = pl.pallas_call(
        kernel,
        out_shape=jax.ShapeDtypeStruct((rows_padded, D), x.dtype),
        grid_spec=pltpu.PrefetchScalarGridSpec(
            num_scalar_prefetch=1,
            grid=(ntiles, E, n_h),
            in_specs=[
                pl.BlockSpec((tm, D), lambda i, e, h, a: (i, 0)),          # x
                pl.BlockSpec((1, tm, 1), lambda i, e, h, a: (e, i, 0)),    # cw
                pl.BlockSpec((1, D, 2 * th),
                             lambda i, e, h, a: (a[i, e], 0, h)),          # w1||w3
                pl.BlockSpec((1, th, D),
                             lambda i, e, h, a: (a[i, e], h, 0)),          # w2
            ],
            out_specs=pl.BlockSpec((tm, D), lambda i, e, h, a: (i, 0)),
            scratch_shapes=[pltpu.VMEM((tm, D), jnp.float32)],
        ),
        compiler_params=pltpu.CompilerParams(
            dimension_semantics=("parallel", "arbitrary", "arbitrary"),
            vmem_limit_bytes=vmem_limit,
        ),
    )(alias, x2d, cw_e, w13, w2p)

    return out2d[:rows].reshape(B, S, D)


# --------------------------------------------------------------------------
# Demo / correctness check
# --------------------------------------------------------------------------
if __name__ == "__main__":
    key = jax.random.PRNGKey(0)
    B, S, D = 2, 8, 32        # batch, seq, hidden
    H, E, TOPK = 64, 4, 2     # expert FFN hidden, num experts, top-k
    dt = jnp.float32

    kx, kg, k1, k3, k2 = jax.random.split(key, 5)
    x = jax.random.normal(kx, (B, S, D), dtype=dt)
    gate_w = jax.random.normal(kg, (D, E), dtype=dt) / (D ** 0.5)
    w1 = jax.random.normal(k1, (E, D, H), dtype=dt) / (D ** 0.5)
    w3 = jax.random.normal(k3, (E, D, H), dtype=dt) / (D ** 0.5)
    w2 = jax.random.normal(k2, (E, H, D), dtype=dt) / (H ** 0.5)

    out = moe_forward(x, gate_w, w1, w3, w2, TOPK)
    jax.block_until_ready(out)
    assert out.shape == x.shape

    # Reference: same routing math (shared helper, plain JAX) + per-expert
    # SwiGLU loop, mirroring the PyTorch MoeLayer accumulation.
    cw_ref = _route(x.reshape(B * S, D), gate_w, TOPK).reshape(B, S, E)
    ref = jnp.zeros_like(x)
    for e in range(E):
        he = jax.nn.silu(jnp.einsum("bsd,dh->bsh", x, w1[e], precision="highest"))
        he = he * jnp.einsum("bsd,dh->bsh", x, w3[e], precision="highest")
        ye = jnp.einsum("bsh,hd->bsd", he, w2[e], precision="highest")
        ref = ref + cw_ref[..., e, None].astype(dt) * ye

    # Tolerance covers MXU f32 matmuls vs XLA 'highest' einsum.
    assert jnp.allclose(out, ref, atol=2e-2, rtol=2e-2), float(
        jnp.max(jnp.abs(out - ref))
    )
    print("KERNEL_OK")
</pallas_src>

<mosaic_0001>
module attributes {stable_mosaic.version = 11 : i64} {
  func.func @_moe_expert_kernel(%arg0: i32, %arg1: i32, %arg2: i32, %arg3: memref<1x4xi32, #tpu.memory_space<smem>>, %arg4: memref<16x32xf32, #tpu.memory_space<vmem>>, %arg5: memref<1x16x1xf32, #tpu.memory_space<vmem>>, %arg6: memref<1x32x128xf32, #tpu.memory_space<vmem>>, %arg7: memref<1x64x32xf32, #tpu.memory_space<vmem>>, %arg8: memref<16x32xf32, #tpu.memory_space<vmem>>, %arg9: memref<16x32xf32, #tpu.memory_space<vmem>>) attributes {dimension_semantics = [#tpu.dimension_semantics<parallel>, #tpu.dimension_semantics<arbitrary>, #tpu.dimension_semantics<arbitrary>], iteration_bounds = array<i64: 1, 4, 1>, scalar_prefetch = 1 : i64, scratch_operands = 1 : i64, tpu.core_type = #tpu.core_type<tc>, window_params = [{transform_indices = @transform_0, window_bounds = array<i64: 16, 32>}, {transform_indices = @transform_1, window_bounds = array<i64: 1, 16, 1>}, {transform_indices = @transform_2, window_bounds = array<i64: 1, 32, 128>}, {transform_indices = @transform_3, window_bounds = array<i64: 1, 64, 32>}, {transform_indices = @transform_4, window_bounds = array<i64: 16, 32>}]} {
    %c0_i32 = arith.constant 0 : i32
    %0 = arith.cmpi eq, %arg1, %c0_i32 : i32
    %c0_i32_0 = arith.constant 0 : i32
    %1 = arith.cmpi eq, %arg2, %c0_i32_0 : i32
    %2 = arith.andi %0, %1 : i1
    %3 = arith.extui %2 : i1 to i32
    %c0_i32_1 = arith.constant 0 : i32
    %4 = arith.cmpi ne, %3, %c0_i32_1 : i32
    scf.if %4 {
      %cst = arith.constant 0.000000e+00 : f32
      %16 = vector.broadcast %cst : f32 to vector<16x32xf32>
      %c0 = arith.constant 0 : index
      %c0_5 = arith.constant 0 : index
      %17 = vector.load %arg9[%c0, %c0_5] : memref<16x32xf32, #tpu.memory_space<vmem>>, vector<16x32xf32>
      tpu.vector_store %arg9[%c0, %c0_5], %16 {strides = array<i32>} : memref<16x32xf32, #tpu.memory_space<vmem>>, vector<16x32xf32>,
    } else {
    }
    %5 = arith.index_cast %arg0 : i32 to index
    %6 = arith.index_cast %arg1 : i32 to index
    %7 = memref.load %arg3[%5, %6] : memref<1x4xi32, #tpu.memory_space<smem>>
    %8 = arith.cmpi eq, %7, %arg1 : i32
    %9 = arith.extui %8 : i1 to i32
    %c0_i32_2 = arith.constant 0 : i32
    %10 = arith.cmpi ne, %9, %c0_i32_2 : i32
    scf.if %10 {
      %c0 = arith.constant 0 : index
      %c0_5 = arith.constant 0 : index
      %16 = vector.load %arg4[%c0, %c0_5] : memref<16x32xf32, #tpu.memory_space<vmem>>, vector<16x32xf32>
      %c0_6 = arith.constant 0 : index
      %c0_7 = arith.constant 0 : index
      %c0_8 = arith.constant 0 : index
      %17 = vector.load %arg6[%c0_6, %c0_7, %c0_8] : memref<1x32x128xf32, #tpu.memory_space<vmem>>, vector<1x32x128xf32>
      %18 = vector.shape_cast %17 : vector<1x32x128xf32> to vector<32x128xf32>
      %cst = arith.constant dense<0.000000e+00> : vector<16x128xf32>
      %19 = tpu.matmul %16, %18, %cst {dimension_numbers = #tpu.dot_dimension_numbers<[1], [0], [0], [1], [0, 0, 1, 1], [], []>} : vector<16x32xf32>, vector<32x128xf32>, vector<16x128xf32> -> vector<16x128xf32>
      %20 = vector.extract_strided_slice %19 {offsets = [0, 0], sizes = [16, 64], strides = [1, 1]} : vector<16x128xf32> to vector<16x64xf32>
      %21 = vector.extract_strided_slice %19 {offsets = [0, 64], sizes = [16, 64], strides = [1, 1]} : vector<16x128xf32> to vector<16x64xf32>
      %22 = arith.negf %20 : vector<16x64xf32>
      %23 = math.exp %22 : vector<16x64xf32>
      %cst_9 = arith.constant 1.000000e+00 : f32
      %24 = vector.broadcast %cst_9 : f32 to vector<16x64xf32>
      %25 = arith.addf %24, %23 : vector<16x64xf32>
      %26 = arith.divf %24, %25 : vector<16x64xf32>
      %27 = arith.mulf %20, %26 : vector<16x64xf32>
      %28 = arith.mulf %27, %21 : vector<16x64xf32>
      %c0_10 = arith.constant 0 : index
      %c0_11 = arith.constant 0 : index
      %c0_12 = arith.constant 0 : index
      %29 = vector.load %arg7[%c0_10, %c0_11, %c0_12] : memref<1x64x32xf32, #tpu.memory_space<vmem>>, vector<1x64x32xf32>
      %30 = vector.shape_cast %29 : vector<1x64x32xf32> to vector<64x32xf32>
      %cst_13 = arith.constant dense<0.000000e+00> : vector<16x32xf32>
      %31 = tpu.matmul %28, %30, %cst_13 {dimension_numbers = #tpu.dot_dimension_numbers<[1], [0], [0], [1], [0, 0, 1, 1], [], []>} : vector<16x64xf32>, vector<64x32xf32>, vector<16x32xf32> -> vector<16x32xf32>
      %c0_14 = arith.constant 0 : index
      %c0_15 = arith.constant 0 : index
      %32 = vector.load %arg9[%c0_14, %c0_15] : memref<16x32xf32, #tpu.memory_space<vmem>>, vector<16x32xf32>
      %c0_16 = arith.constant 0 : index
      %c0_17 = arith.constant 0 : index
      %c0_18 = arith.constant 0 : index
      %33 = vector.load %arg5[%c0_16, %c0_17, %c0_18] : memref<1x16x1xf32, #tpu.memory_space<vmem>>, vector<1x16x1xf32>
      %34 = vector.shape_cast %33 : vector<1x16x1xf32> to vector<16x1xf32>
      %35 = vector.broadcast %34 : vector<16x1xf32> to vector<16x32xf32>
      %36 = arith.mulf %35, %31 : vector<16x32xf32>
      %37 = arith.addf %32, %36 : vector<16x32xf32>
      %c0_19 = arith.constant 0 : index
      %c0_20 = arith.constant 0 : index
      %38 = vector.load %arg9[%c0_19, %c0_20] : memref<16x32xf32, #tpu.memory_space<vmem>>, vector<16x32xf32>
      tpu.vector_store %arg9[%c0_19, %c0_20], %37 {strides = array<i32>} : memref<16x32xf32, #tpu.memory_space<vmem>>, vector<16x32xf32>,
    } else {
    }
    %c3_i32 = arith.constant 3 : i32
    %11 = arith.cmpi eq, %arg1, %c3_i32 : i32
    %c0_i32_3 = arith.constant 0 : i32
    %12 = arith.cmpi eq, %arg2, %c0_i32_3 : i32
    %13 = arith.andi %11, %12 : i1
    %14 = arith.extui %13 : i1 to i32
    %c0_i32_4 = arith.constant 0 : i32
    %15 = arith.cmpi ne, %14, %c0_i32_4 : i32
    scf.if %15 {
      %c0 = arith.constant 0 : index
      %c0_5 = arith.constant 0 : index
      %16 = vector.load %arg9[%c0, %c0_5] : memref<16x32xf32, #tpu.memory_space<vmem>>, vector<16x32xf32>
      %c0_6 = arith.constant 0 : index
      %c0_7 = arith.constant 0 : index
      %17 = vector.load %arg8[%c0_6, %c0_7] : memref<16x32xf32, #tpu.memory_space<vmem>>, vector<16x32xf32>
      tpu.vector_store %arg8[%c0_6, %c0_7], %16 {strides = array<i32>} : memref<16x32xf32, #tpu.memory_space<vmem>>, vector<16x32xf32>,
    } else {
    }
    return
  }
  func.func @transform_0(%arg0: i32, %arg1: i32, %arg2: i32, %arg3: memref<1x4xi32, #tpu.memory_space<smem>>) -> (i32, i32) {
    %c0_i32 = arith.constant 0 : i32
    %c0_i32_0 = arith.constant 0 : i32
    return %arg0, %c0_i32 : i32, i32
  }
  func.func @transform_1(%arg0: i32, %arg1: i32, %arg2: i32, %arg3: memref<1x4xi32, #tpu.memory_space<smem>>) -> (i32, i32, i32) {
    %c0_i32 = arith.constant 0 : i32
    %c0_i32_0 = arith.constant 0 : i32
    return %arg1, %arg0, %c0_i32 : i32, i32, i32
  }
  func.func @transform_2(%arg0: i32, %arg1: i32, %arg2: i32, %arg3: memref<1x4xi32, #tpu.memory_space<smem>>) -> (i32, i32, i32) {
    %0 = arith.index_cast %arg0 : i32 to index
    %1 = arith.index_cast %arg1 : i32 to index
    %2 = memref.load %arg3[%0, %1] : memref<1x4xi32, #tpu.memory_space<smem>>
    %c0_i32 = arith.constant 0 : i32
    %c0_i32_0 = arith.constant 0 : i32
    return %2, %c0_i32, %arg2 : i32, i32, i32
  }
  func.func @transform_3(%arg0: i32, %arg1: i32, %arg2: i32, %arg3: memref<1x4xi32, #tpu.memory_space<smem>>) -> (i32, i32, i32) {
    %0 = arith.index_cast %arg0 : i32 to index
    %1 = arith.index_cast %arg1 : i32 to index
    %2 = memref.load %arg3[%0, %1] : memref<1x4xi32, #tpu.memory_space<smem>>
    %c0_i32 = arith.constant 0 : i32
    %c0_i32_0 = arith.constant 0 : i32
    return %2, %arg2, %c0_i32 : i32, i32, i32
  }
  func.func @transform_4(%arg0: i32, %arg1: i32, %arg2: i32, %arg3: memref<1x4xi32, #tpu.memory_space<smem>>) -> (i32, i32) {
    %c0_i32 = arith.constant 0 : i32
    %c0_i32_0 = arith.constant 0 : i32
    return %arg0, %c0_i32 : i32, i32
  }
}

</mosaic_0001>

<bundles_post_ra>
// kernel: tpu_custom_call.1
= control target key start
LH: loop header
LB: loop body
LE: loop exit
PB: predicated region body
PF: predicated region fallthrough
CT: control target
= control target key end

     0   :  { %s1167_s0 = inlined_call_operand.vmem [shape: s32[1,4], index: 0, kind: input, shape index: {}]   ;;  %s1168_s1 = inlined_call_operand.vmem [shape: f32[16,32], index: 1, kind: input, shape index: {}]   ;;  %s1169_s2 = inlined_call_operand.vmem [shape: f32[4,16,1], index: 2, kind: input, shape index: {}]   ;;  %s1170_s3 = inlined_call_operand.vmem [shape: f32[4,32,128], index: 3, kind: input, shape index: {}]   ;;  %s1171_s4 = inlined_call_operand.vmem [shape: f32[4,64,32], index: 4, kind: input, shape index: {}]   ;;  %s1172_s5 = inlined_call_operand.hbm [shape: f32[16,32], index: 5, kind: output, shape index: {}]  }
   0x1   :  { %s10_s20 = sshll.u32 %s1167_s0, 4  ;;  %s11_s20 = int_to_ptr.vmem [resolvable:$true] %s10_s20 }
   0x2   :  { %s961_s21 = scalar_lea.vmem %s11_s20, 16  ;;  %p966_p1 = scmp.lt.s32.totalorder %s11_s20, %s11_s20 }
   0x3   :  { %p962_p0 = scmp.ne.s32.totalorder %s11_s20, %s961_s21  ;;  %p967_p2 = scmp.lt.s32.totalorder %s961_s21, %s961_s21 }
   0x5   :  { %p968_p3 = por %p967_p2, %p966_p1 }
   0x7   :  { %p969_p4 = pnand %p968_p3, %p962_p0 }
   0x9   :  { %972 = shalt.err (!%p969_p4)  }
   0xa   :  { %s1029_s22 = smov [#allocation4]  }
   0xb   :  { %13 = dma.vmem_to_smem %s11_s20, 16, %s1029_s22, [#allocation3] }
   0xc   :  { %1011 = dma.done.wait [#allocation3], 16 }
   0xd   :  { %1012 = vsyncadd [#allocation3], 4294967280 }
   0xe   :  { %15 = sfence }
   0xf   :  { %16 = vsyncpa [#allocation6], 0  ;;  %s1069_s23 = smov 0   ;;  %s1071_s24 = smov 0  }
  0x10   :  { %s1073_s25 = smov 0  }
  0x11 LB: > { %s808_s0 = sadd.s32 4294967295, %s1027_s25   ;;  %s37_s26 = sadd.s32 1, %s1023_s24  ;;  %s1027_s25 = sphi %s1073_s25, %s22_s25   ;;  %s1023_s24 = sphi %s1071_s24, %s1175_s24   ;;  %s1019_s23 = sphi %s1069_s23, %s1174_s23  }
  0x12   : > { %p39_p5 = scmp.ge.s32.totalorder %s37_s26, 4  ;;  %p816_p6 = scmp.ge.s32.totalorder %s1027_s25, 1 }
  0x13   : > { %p303_p7 = scmp.lt.s32.totalorder %s1027_s25, 5 }
  0x14   : > { %s1177_s26 = smov (%p39_p5, %s37_s26), 0 }
  0x15   : > { %p304_p8 = pnand %p816_p6, %p303_p7 }
  0x16   : > { %p373_p9 = scmp.lt.s32.totalorder (!%p304_p8), %s1019_s23, 3  ;;  %s382_s27 = sshra.s32 (!%p304_p8), %s1019_s23, 7 }
  0x17   : > { %307 = sbr.rel (%p304_p8) target bundleno = 643 (0x283), region = 36  ;;  %s819_s28 = sshll.u32 (!%p304_p8), %s382_s27, 7 }
  0x18   : > { %s387_s29 = sand.u32 (!%p304_p8), 127, %s1019_s23  ;;  %p433_p10 = scmp.eq.s32.totalorder (!%p304_p8), %s1019_s23, 0 }
  0x19   : > { %s388_s6 = sadd.s32 (!%p304_p8), %s819_s28, %s387_s29 }
  0x1a   : > { %s389_s8 = sld [smem:[#allocation4 + %s388_s6]] (!%p304_p8) }
  0x1b   : > { %s413_s12 = sld [smem:[#allocation4 + %s388_s6]] (!%p304_p8) }
  0x1e   : > { %s374_s30 = scalar_select %p373_p9, %s1019_s23, 3 }
  0x1f   : > { %438 = sbr.rel (!%p433_p10) target bundleno = 38 (0x26), region = 40  ;;  %vm439_vm0 = vcmask (%p433_p10), 261120   ;;  %v1030_v0 = vmov (%p433_p10), 0.0  }
  0x20   : > { %s839_s7 = sshll.u32 %s374_s30, 4  ;;  %p390_p11 = scmp.lt.s32.totalorder %s389_s8, 3  ;;  %440 = vst.msk [vmem:[#allocation2] sm:$0xff] (%p433_p10), %vm439_vm0, %v1030_v0  ;;  %441 = vst.msk [vmem:[#allocation2 + $0x8] sm:$0xff] (%p433_p10), %vm439_vm0, %v1030_v0 }
  0x21   : > { %s1098_s11 = scalar_lea.vmem %s1169_s2, %s839_s7  ;;  %p415_p12 = scmp.lt.s32.totalorder %s413_s12, 3 }
  0x22   : > { %s1179_s8 = smov (!%p390_p11, %s389_s8), 3 }
  0x23   : > { %s1181_s12 = smov (!%p415_p12, %s413_s12), 3  ;;  %s840_s13 = sshll.u32 %s1179_s8, 5 }
  0x24   : > { %s397_s16 = scalar_lea.vmem %s1170_s3, %s840_s13  ;;  %s841_s17 = sshll.u32 %s1181_s12, 6 }
  0x25   : > { %s1106_s20 = scalar_lea.vmem %s1171_s4, %s841_s17 }
  0x26 PF: > { %s449_s21 = sld [smem:[#allocation4 + %s388_s6]] }
  0x2c   : > { %p827_p13 = scmp.ne.s32.totalorder %s449_s21, %s1019_s23 }
  0x2d   : > { %v456_v1 = vld [vmem:[%s397_s16] sm:$0xff] (!%p827_p13)  ;;  %v457_v2 = vld [vmem:[%s397_s16 + $0x8] sm:$0xff] (!%p827_p13)  ;;  %v458_v3 = vld [vmem:[%s397_s16 + $0x10] sm:$0xff] (!%p827_p13)  ;;  %vm460_vm1 = vcmask (!%p827_p13), 261120   ;;  %v1031_v22 = vmov (!%p827_p13), 0   ;;  %s1032_s30 = smov (!%p827_p13), 64  }
  0x2e   : > { %453 = sbr.rel (%p827_p13) target bundleno = 608 (0x260), region = 44  ;;  %v890_v4 = vpack.c.bf16 (!%p827_p13), %v457_v2, %v456_v1  ;;  %v459_v5 = vld [vmem:[%s397_s16 + $0x18] sm:$0xff] (!%p827_p13)  ;;  %v454_v6 = vld [vmem:[%s1168_s1] sm:$0xff] (!%p827_p13)  ;;  %v455_v8 = vld [vmem:[%s1168_s1 + $0x8] sm:$0xff] (!%p827_p13)  ;;  %951 = vset.pattern.permute.xlu1 (!%p827_p13), %v1031_v22  ;;  %952 = vset.pattern.permute.xlu0 (!%p827_p13), %v1031_v22  ;;  %vm574_vm2 = vcmask (!%p827_p13), 523264  }
  0x2f   : > { %v894_v7 = vpack.c.bf16 (!%p827_p13), %v459_v5, %v458_v3  ;;  %868 = vmatprep.mubr.msk.f32.mxu0 (!%p827_p13), %vm460_vm1, %v454_v6  ;;  %v566_v9 = vld [vmem:[%s1106_s20] sm:$0xff] (!%p827_p13)  ;;  %v567_v10 = vld [vmem:[%s1106_s20 + $0x8] sm:$0xff] (!%p827_p13)  ;;  %v568_v11 = vld [vmem:[%s1106_s20 + $0x10] sm:$0xff] (!%p827_p13) }
  0x30   : > { %891 = vmatprep.subr.bf16.mxu0 (!%p827_p13), %v890_v4  ;;  %v898_v12 = vpack.c.bf16 (!%p827_p13), %v567_v10, %v566_v9  ;;  %v569_v13 = vld [vmem:[%s1106_s20 + $0x18] sm:$0xff] (!%p827_p13)  ;;  %v570_v15 = vld [vmem:[%s1106_s20 + $0x20] sm:$0xff] (!%p827_p13)  ;;  %v571_v16 = vld [vmem:[%s1106_s20 + $0x28] sm:$0xff] (!%p827_p13) }
  0x31   : > { %893 = vmatpush3.bf16.msra.mxu0 (!%p827_p13), %v890_v4  ;;  %v902_v14 = vpack.c.bf16 (!%p827_p13), %v569_v13, %v568_v11  ;;  %v906_v17 = vpack.c.bf16 (!%p827_p13), %v571_v16, %v570_v15  ;;  %v572_v18 = vld [vmem:[%s1106_s20 + $0x30] sm:$0xff] (!%p827_p13)  ;;  %v573_v19 = vld [vmem:[%s1106_s20 + $0x38] sm:$0xff] (!%p827_p13)  ;;  %v658_v21 = vld [vmem:[%s1098_s11] sm:$0xff] (!%p827_p13) }
  0x32   : > { %895 = vmatprep.subr.bf16.mxu0 (!%p827_p13), %v894_v7  ;;  %899 = vmatprep.subr.bf16.mxu1 (!%p827_p13), %v898_v12  ;;  %v910_v20 = vpack.c.bf16 (!%p827_p13), %v573_v19, %v572_v18  ;;  %v659_v23 = vld [vmem:[%s1098_s11 + $0x8] sm:$0xff] (!%p827_p13)  ;;  %v656_v46 = vld [vmem:[#allocation2] sm:$0xff] (!%p827_p13) }
  0x33   : > { %901 = vmatpush3.bf16.msra.mxu1 (!%p827_p13), %v898_v12  ;;  %662 = vperm.xlu1 (!%p827_p13), %951, %v658_v21   ;;  %v657_v43 = vld [vmem:[#allocation2 + $0x8] sm:$0xff] (!%p827_p13) }
  0x34   : > { %903 = vmatprep.subr.bf16.mxu1 (!%p827_p13), %v902_v14 }
  0x35   : > { %897 = vmatpush3.bf16.msra.mxu0 %v894_v7 }
  0x37   : > { %905 = vmatpush3.bf16.msra.mxu1 %v902_v14  ;;  %667 = vperm.xlu1 %951, %v659_v23  }
  0x38   : > { %869 = vmatmul.mubr.msk.f32.vlgmr.msra.gmra.mrb[0].mxu0 %vm460_vm1, %v455_v8  ;;  %907 = vmatprep.subr.bf16.mxu1 %v906_v17 }
  0x3b   : > { %909 = vmatpush3.bf16.msra.mxu1 %v906_v17 }
  0x3c   : > { %911 = vmatprep.subr.bf16.mxu1 %v910_v20 }
  0x3f   : > { %913 = vmatpush3.bf16.msra.mxu1 %v910_v20 }
  0xb2   : > { %v663_v40 = vpop.permute.xlu1 %662 }
  0xb6   : > { %v668_v41 = vpop.permute.xlu1 %667 }
 0x10b   : > { %v870_v24 = vpop.f32.mrb[0].mxu0 }
 0x10c   : > { %v533_v25 = vpop.f32.mrb[1].mxu0  ;;  %v831_v27 = vmul.f32 -1.442695, %v870_v24 }
 0x10d   : > { %558 = vrot.lane.b32.xlu0 %v533_v25, %s1032_s30  ;;  %v830_v26 = vmul.f32 -1.442695, %v533_v25 }
 0x10f   : > { %953 = vpow2.f32 %v830_v26 }
 0x110   : > { %955 = vpow2.f32 %v831_v27 }
 0x111   : > { %560 = vrot.lane.b32.xlu0 %v870_v24, %s1032_s30 }
 0x119   : > { %v954_v28 = vpop.eup %953 }
 0x11a   : > { %v548_v29 = vadd.f32 1.0, %v954_v28  ;;  %v956_v30 = vpop.eup %955 }
 0x11b   : > { %v549_v31 = vadd.f32 1.0, %v956_v30 }
 0x11c   : > { %957 = vrcp.f32 %v548_v29 }
 0x11d   : > { %959 = vrcp.f32 %v549_v31 }
 0x126   : > { %v958_v32 = vpop.eup %957 }
 0x127   : > { %v554_v33 = vmul.f32 %v958_v32, %v533_v25  ;;  %v960_v34 = vpop.eup %959 }
 0x128   : > { %v555_v37 = vmul.f32 %v960_v34, %v870_v24 }
 0x17f   : > { %v559_v35 = vpop.permute.xlu0 %558 }
 0x180   : > { %v564_v36 = vmul.f32 %v559_v35, %v554_v33 }
 0x182   : > { %887 = vmatprep.mubr.msk.f32.mxu1 %vm574_vm2, %v564_v36 }
 0x183   : > { %v561_v38 = vpop.permute.xlu0 %560 }
 0x184   : > { %v565_v39 = vmul.f32 %v561_v38, %v555_v37 }
 0x186   : > { %888 = vmatmul.mubr.msk.f32.vlgmr.msra.gmra.mrb[0].mxu1 %vm574_vm2, %v565_v39 }
 0x259   : > { %v889_v42 = vpop.f32.mrb[0].mxu1 }
 0x25a   : > { %v671_v44 = vmul.f32 %v889_v42, %v668_v41  ;;  %v647_v45 = vpop.f32.mrb[1].mxu1 }
 0x25b   : > { %v670_v47 = vmul.f32 %v663_v40, %v647_v45 }
 0x25c   : > { %v673_v48 = vadd.f32 %v671_v44, %v657_v43 }
 0x25d   : > { %v672_v49 = vadd.f32 %v670_v47, %v656_v46 }
 0x25e   : > { %675 = vst.msk [vmem:[#allocation2 + $0x8] sm:$0xff] %vm460_vm1, %v673_v48 }
 0x25f   : > { %674 = vst.msk [vmem:[#allocation2] sm:$0xff] %vm460_vm1, %v672_v49 }
 0x260 PF: > { %p676_p0 = scmp.eq.s32.totalorder %s1019_s23, 3 }
 0x261   : > { %vm683_vm3 = vcmask (%p676_p0), 261120  }
 0x262   : > { %680 = sbr.rel (!%p676_p0) target bundleno = 617 (0x269), region = 48 }
 0x265   : > { %v682_v51 = vld [vmem:[#allocation2 + $0x8] sm:$0xff] (%p676_p0) }
 0x266   : > { %v681_v50 = vld [vmem:[#allocation2] sm:$0xff] (%p676_p0)  ;;  %685 = vst.msk [vmem:[#allocation5 + $0x8] sm:$0xff] (%p676_p0), %vm683_vm3, %v682_v51 }
 0x267   : > { %684 = vst.msk [vmem:[#allocation5] sm:$0xff] (%p676_p0), %vm683_vm3, %v681_v50 }
 0x269 PF: > { %p1132_p1 = scmp.eq.s32.totalorder %s808_s0, 3  ;;  %s1033_s7 = smov [#allocation5]  }
 0x26a   : > { %s695_s8 = sshll.u32 %s1033_s7, 4  ;;  %s696_s8 = int_to_ptr.vmem [resolvable:$true] %s695_s8 }
 0x26b   : > { %s973_s9 = scalar_lea.vmem %s696_s8, 256  ;;  %p980_p5 = scmp.lt.s32.totalorder %s696_s8, %s696_s8 }
 0x26c   : > { %p974_p2 = scmp.ne.s32.totalorder %s696_s8, %s973_s9  ;;  %p981_p6 = scmp.lt.s32.totalorder %s973_s9, %s973_s9 }
 0x26e   : > { %p975_p3 = pnand %p974_p2, %p1132_p1  ;;  %p982_p7 = por %p981_p6, %p980_p5 }
 0x270   : > { %p976_p4 = pneg %p975_p3 }
 0x272   : > { %p983_p8 = pnand %p982_p7, %p976_p4 }
 0x274   : > { %986 = shalt.err (!%p983_p8)
}
 0x275   : > { %s987_s0 = scalar_lea.hbm %s1172_s5, 256 }
 0x276   : > { %p988_p9 = scmp.ne.s32.totalorder %s1172_s5, %s987_s0  ;;  %p993_p12 = scmp.lt.u32.totalorder %s987_s0, %s1172_s5 }
 0x278   : > { %p989_p10 = pnand %p988_p9, %p1132_p1 }
 0x27a   : > { %p990_p11 = pneg %p989_p10 }
 0x27c   : > { %p995_p13 = pnand %p993_p12, %p990_p11 }
 0x27e   : > { %998 = shalt.err (!%p995_p13)
}
 0x27f   : > { %s1034_s15 = smov 128   ;;  %s1035_s16 = smov 8  }
 0x280   : > { %915 = dma.vmem_to_hbm [thread:$0]  (%p1132_p1), %s696_s8, 256, %s1172_s5, [#allocation6], %s1034_s15, %s1034_s15, %s1035_s16  }
 0x281   : > { %1014 = dma.done.wait (%p1132_p1), [#allocation6], 256  }
 0x282   : > { %1016 = vsyncadd (%p1132_p1), [#allocation6], 4294967040 }
 0x283 PF: > { %s22_s25 = sadd.s32 1, %s1027_s25   ;;  %s1174_s23 = smov %s1023_s24 }
 0x284   : > { %p19_p0 = scmp.ge.s32.totalorder %s22_s25, 6   ;;  %s1175_s24 = smov %s1177_s26 }
 0x286   :  { %21 = sbr.rel (!%p19_p0) target bundleno = 17 (0x11), region = 85 }
 0x28d   :  { %711 = vsyncpa [#allocation6], 1 }
 0x28e   :  { %713 = vsyncpa [#allocation6 + $0x1], 1 }

</bundles_post_ra>
